<compile_context>
chip_gen: v7x
topology: tpu7x:2x2x1
jax: 0.10.0
libtpu: 0.0.40
codegen_flags: <defaults>
</compile_context>

<pallas_src>
import functools

import jax
import jax.numpy as jnp
import numpy as np
from jax.experimental import pallas as pl
from jax.experimental.pallas import tpu as pltpu

_LANE = 128
_PAD_BASE = 256   # N is padded to a multiple of this; tiles are multiples of it.


def _round_up(x, m):
    return ((x + m - 1) // m) * m


def _vmem_limits():
    """Per-generation VMEM limit / tile budget (v5e/v6e: 128 MiB, v7x: 64 MiB)."""
    cap = 64 * 1024 * 1024  # conservative fallback (v7x per-TC capacity)
    try:
        info = pltpu.get_tpu_info()
        cap = int(getattr(info, "vmem_capacity_bytes", cap))
    except Exception:
        pass
    limit = max(32 * 1024 * 1024, min(int(cap * 0.70), 112 * 1024 * 1024))
    budget = max(24 * 1024 * 1024, min(int(cap * 0.55), 80 * 1024 * 1024))
    return limit, budget


def _choose_tiles(n_p, d_in, d_out_p, vmem_budget):
    """Pick (tile_n, tile_k): large A blocks, bf16-legal (mult. of 256), in budget."""
    tile_k = _PAD_BASE
    for cand in (1024, 512):
        if n_p % cand == 0:
            tile_k = cand
            break

    tile_n = _PAD_BASE
    for t in (2048, 1024, 512, 256):
        if t <= n_p and n_p % t == 0:
            need = (2 * t * tile_k * 2            # A, double-buffered bf16
                    + 2 * tile_k * d_in * 2        # X chunk, double-buffered bf16
                    + 2 * d_in * d_out_p * 2       # W_r, double-buffered bf16
                    + 2 * t * d_out_p * 4          # output block (worst case f32), db
                    + t * d_out_p * 4              # f32 accumulator scratch
                    + tile_k * d_out_p * 4         # per-chunk xw intermediate
                    + d_out_p * 8)                 # bias
            if need <= vmem_budget:
                tile_n = t
                break

    # Keep >= 2 row tiles when possible so v7x's two TensorCores both get work.
    while tile_n > _PAD_BASE and n_p // tile_n < 2:
        tile_n //= 2
    return tile_n, tile_k


def _block_sparsity(adj_np, n_p, tile_n, tile_k):
    """Host-side nonzero-block metadata for the block-sparse adjacency path."""
    R, N, _ = adj_np.shape
    a = np.zeros((R, n_p, n_p), dtype=np.float32)
    a[:, :N, :N] = adj_np
    n_i, n_k = n_p // tile_n, n_p // tile_k
    nz = np.abs(a.reshape(R, n_i, tile_n, n_k, tile_k)).sum(axis=(2, 4)) > 0.0
    counts = nz.sum(axis=2).T.astype(np.int32)          # (n_i, R)
    nmax = max(1, int(counts.max()))
    kblocks = np.zeros((n_i, R, nmax), dtype=np.int32)
    for i in range(n_i):
        for r in range(R):
            idx = np.nonzero(nz[r, i])[0].astype(np.int32)
            c = idx.size
            if c > 0:
                kblocks[i, r, :c] = idx
                kblocks[i, r, c:] = idx[-1]   # repeat last valid index -> DMA skipped
    return kblocks.reshape(-1), counts.reshape(-1), nmax, int(counts.sum())


def _rgcn_layer_kernel(kb_ref, cnt_ref, a_ref, x_ref, w_ref, b_ref, o_ref,
                       acc_ref, *, num_rels, apply_relu):
    del kb_ref  # only used inside the index_maps
    i = pl.program_id(0)
    r = pl.program_id(1)
    k = pl.program_id(2)

    @pl.when((r == 0) & (k == 0))
    def _():
        acc_ref[...] = jnp.zeros_like(acc_ref)

    # Skip compute for padded (empty) blocks of this (row-tile, relation) pair.
    @pl.when(k < cnt_ref[i * num_rels + r])
    def _():
        # message transform for this src chunk only: (tile_k, D_in) @ (D_in, Dp)
        xw = jnp.dot(x_ref[...], w_ref[...], preferred_element_type=jnp.float32)
        # normalized aggregation: (tile_n, tile_k) @ (tile_k, Dp), f32 accumulate
        acc_ref[...] += jnp.dot(a_ref[...], xw.astype(jnp.bfloat16),
                                preferred_element_type=jnp.float32)

    @pl.when((r == pl.num_programs(1) - 1) & (k == pl.num_programs(2) - 1))
    def _():
        out = acc_ref[...] + b_ref[...]
        if apply_relu:
            out = jnp.maximum(out, 0.0)
        o_ref[...] = out.astype(o_ref.dtype)


def rgcn_layer(adj_p, x, w, b, kblocks, counts, nmax, nnz, tile_n, tile_k,
               *, out_dtype, apply_relu, vmem_limit):
    """One RelGraphConv layer (regularizer='none', no self loop).

    adj_p:   (R, N_p, N_p) bfloat16 padded normalized adjacency (dst, src)
    x:       (N_p, D_in)   bfloat16 node features
    w:       (R, D_in, Dp) bfloat16 per-relation weights, Dp multiple of 128
    b:       (1, Dp)       float32 bias (zero-padded)
    kblocks: (n_i*R*nmax,) int32 nonzero src-block indices (scalar-prefetched)
    counts:  (n_i*R,)      int32 nonzero block counts per (row-tile, relation)
    """
    R, N_p, _ = adj_p.shape
    D_in = x.shape[1]
    Dp = w.shape[2]
    n_i = N_p // tile_n
    out_bytes = 2 if out_dtype == jnp.bfloat16 else 4

    kernel = functools.partial(_rgcn_layer_kernel, num_rels=R,
                               apply_relu=apply_relu)

    cost = pl.CostEstimate(
        flops=2 * nnz * (tile_n * tile_k * Dp + tile_k * D_in * Dp),
        transcendentals=0,
        bytes_accessed=(nnz * tile_n * tile_k * 2 + nnz * tile_k * D_in * 2
                        + n_i * R * D_in * Dp * 2 + N_p * Dp * out_bytes),
    )

    def a_map(i, r, k, kb, cnt):
        return (r, i, kb[(i * R + r) * nmax + k])

    def x_map(i, r, k, kb, cnt):
        return (kb[(i * R + r) * nmax + k], 0)

    return pl.pallas_call(
        kernel,
        out_shape=jax.ShapeDtypeStruct((N_p, Dp), out_dtype),
        grid_spec=pltpu.PrefetchScalarGridSpec(
            num_scalar_prefetch=2,
            grid=(n_i, R, nmax),
            in_specs=[
                # A_r block: (tile_n, tile_k) bf16, src block chosen by prefetch
                pl.BlockSpec((None, tile_n, tile_k), a_map),
                # X chunk: (tile_k, D_in) bf16, same data-dependent src block
                pl.BlockSpec((tile_k, D_in), x_map),
                # W_r: (D_in, Dp) bf16
                pl.BlockSpec((None, D_in, Dp), lambda i, r, k, kb, cnt: (r, 0, 0)),
                # bias: (1, Dp) f32
                pl.BlockSpec((1, Dp), lambda i, r, k, kb, cnt: (0, 0)),
            ],
            out_specs=pl.BlockSpec((tile_n, Dp), lambda i, r, k, kb, cnt: (i, 0)),
            scratch_shapes=[pltpu.VMEM((tile_n, Dp), jnp.float32)],
        ),
        compiler_params=pltpu.CompilerParams(
            dimension_semantics=("parallel", "arbitrary", "arbitrary"),
            vmem_limit_bytes=vmem_limit,
        ),
        cost_estimate=cost,
    )(kblocks, counts, adj_p, x, w, b)


def rgcn_forward(adj, emb, w1, b1, w2, b2):
    """h = relu(conv1(g, emb)); h = conv2(g, h)."""
    R, N, _ = adj.shape
    in_dim, h_dim = w1.shape[1], w1.shape[2]
    out_dim = w2.shape[2]
    hp = _round_up(h_dim, _LANE)
    op = _round_up(out_dim, _LANE)

    vmem_limit, vmem_budget = _vmem_limits()
    N_p = _round_up(max(N, _PAD_BASE), _PAD_BASE)
    tile_n, tile_k = _choose_tiles(N_p, max(in_dim, hp), max(hp, op), vmem_budget)

    # Host-side nonzero-block metadata (adjacency is shared by both layers).
    adj_np = np.asarray(jax.device_get(adj), dtype=np.float32)
    kb_np, cnt_np, nmax, nnz = _block_sparsity(adj_np, N_p, tile_n, tile_k)
    kblocks = jnp.asarray(kb_np)
    counts = jnp.asarray(cnt_np)

    # Device-side padded bf16 adjacency / features; zero-pad feature dims to 128.
    adj_b = jnp.zeros((R, N_p, N_p), jnp.bfloat16).at[:, :N, :N].set(
        adj.astype(jnp.bfloat16))
    x_b = jnp.zeros((N_p, in_dim), jnp.bfloat16).at[:N, :].set(
        emb.astype(jnp.bfloat16))
    w1p = jnp.zeros((R, in_dim, hp), jnp.bfloat16).at[:, :, :h_dim].set(
        w1.astype(jnp.bfloat16))
    b1p = jnp.zeros((1, hp), jnp.float32).at[:, :h_dim].set(b1)
    w2p = jnp.zeros((R, hp, op), jnp.bfloat16).at[:, :h_dim, :out_dim].set(
        w2.astype(jnp.bfloat16))
    b2p = jnp.zeros((1, op), jnp.float32).at[:, :out_dim].set(b2)

    # Layer 1 emits bf16 directly (bias + ReLU applied in the f32 epilogue).
    h = rgcn_layer(adj_b, x_b, w1p, b1p, kblocks, counts, nmax, nnz,
                   tile_n, tile_k, out_dtype=jnp.bfloat16, apply_relu=True,
                   vmem_limit=vmem_limit)
    out = rgcn_layer(adj_b, h, w2p, b2p, kblocks, counts, nmax, nnz,
                     tile_n, tile_k, out_dtype=jnp.float32, apply_relu=False,
                     vmem_limit=vmem_limit)
    return out[:N, :out_dim]


def _reference(adj, emb, w1, b1, w2, b2):
    h = jnp.einsum("rvu,ud,rde->ve", adj, emb, w1) + b1
    h = jnp.maximum(h, 0.0)
    h = jnp.einsum("rvu,ud,rde->ve", adj, h, w2) + b2
    return h


if __name__ == "__main__":
    # Small synthetic graph / model sizes.
    num_nodes = 64
    in_dim = 32
    h_dim = 32
    out_dim = 16
    num_rels = 4
    num_edges = 256

    key = jax.random.PRNGKey(0)
    k_emb, k_w1, k_w2, k_src, k_dst, k_et = jax.random.split(key, 6)

    # Parameters (deterministic init). nn.Embedding ~ N(0,1); RelGraphConv
    # per-relation weights uniform-ish; bias zero (DGL default).
    emb = jax.random.normal(k_emb, (num_nodes, in_dim), dtype=jnp.float32)
    w1 = jax.random.uniform(k_w1, (num_rels, in_dim, h_dim), dtype=jnp.float32,
                            minval=-0.1, maxval=0.1)
    b1 = jnp.zeros((1, h_dim), dtype=jnp.float32)
    w2 = jax.random.uniform(k_w2, (num_rels, h_dim, out_dim), dtype=jnp.float32,
                            minval=-0.1, maxval=0.1)
    b2 = jnp.zeros((1, out_dim), dtype=jnp.float32)

    # Synthetic edges: src, dst, etype; norm = 1 / in_degree(dst).
    src = jax.random.randint(k_src, (num_edges,), 0, num_nodes)
    dst = jax.random.randint(k_dst, (num_edges,), 0, num_nodes)
    etype = jax.random.randint(k_et, (num_edges,), 0, num_rels)
    in_deg = jnp.zeros((num_nodes,), jnp.float32).at[dst].add(1.0)
    norm = 1.0 / jnp.maximum(in_deg[dst], 1.0)

    # Dense per-relation normalized adjacency: adj[r, dst, src] += norm_e.
    adj = jnp.zeros((num_rels, num_nodes, num_nodes), jnp.float32)
    adj = adj.at[etype, dst, src].add(norm)

    out = jax.block_until_ready(rgcn_forward(adj, emb, w1, b1, w2, b2))

    ref = _reference(adj, emb, w1, b1, w2, b2)
    # bf16 inputs / bf16 inter-layer activations with f32 accumulation.
    np.testing.assert_allclose(np.asarray(out), np.asarray(ref), rtol=3e-2, atol=3e-2)

    print("KERNEL_OK")
</pallas_src>

<mosaic_0001>
module attributes {stable_mosaic.version = 11 : i64} {
  func.func @_rgcn_layer_kernel(%arg0: i32, %arg1: i32, %arg2: i32, %arg3: memref<4xi32, #tpu.memory_space<smem>>, %arg4: memref<4xi32, #tpu.memory_space<smem>>, %arg5: memref<1x256x256xbf16, #tpu.memory_space<vmem>>, %arg6: memref<256x32xbf16, #tpu.memory_space<vmem>>, %arg7: memref<1x32x128xbf16, #tpu.memory_space<vmem>>, %arg8: memref<1x128xf32, #tpu.memory_space<vmem>>, %arg9: memref<256x128xbf16, #tpu.memory_space<vmem>>, %arg10: memref<256x128xf32, #tpu.memory_space<vmem>>) attributes {dimension_semantics = [#tpu.dimension_semantics<parallel>, #tpu.dimension_semantics<arbitrary>, #tpu.dimension_semantics<arbitrary>], iteration_bounds = array<i64: 1, 4, 1>, scalar_prefetch = 2 : i64, scratch_operands = 1 : i64, tpu.core_type = #tpu.core_type<tc>, window_params = [{transform_indices = @transform_0, window_bounds = array<i64: 1, 256, 256>}, {transform_indices = @transform_1, window_bounds = array<i64: 256, 32>}, {transform_indices = @transform_2, window_bounds = array<i64: 1, 32, 128>}, {pipeline_mode = #tpu.pipeline_mode<synchronous>, transform_indices = @transform_3, window_bounds = array<i64: 1, 128>}, {transform_indices = @transform_4, window_bounds = array<i64: 256, 128>}]} {
    %c0_i32 = arith.constant 0 : i32
    %0 = arith.cmpi eq, %arg1, %c0_i32 : i32
    %c0_i32_0 = arith.constant 0 : i32
    %1 = arith.cmpi eq, %arg2, %c0_i32_0 : i32
    %2 = arith.andi %0, %1 : i1
    %3 = arith.extui %2 : i1 to i32
    %c0_i32_1 = arith.constant 0 : i32
    %4 = arith.cmpi ne, %3, %c0_i32_1 : i32
    scf.if %4 {
      %cst = arith.constant 0.000000e+00 : f32
      %17 = vector.broadcast %cst : f32 to vector<256x128xf32>
      %c0 = arith.constant 0 : index
      %c0_5 = arith.constant 0 : index
      %18 = vector.load %arg10[%c0, %c0_5] : memref<256x128xf32, #tpu.memory_space<vmem>>, vector<256x128xf32>
      tpu.vector_store %arg10[%c0, %c0_5], %17 {strides = array<i32>} : memref<256x128xf32, #tpu.memory_space<vmem>>, vector<256x128xf32>,
    } else {
    }
    %c4_i32 = arith.constant 4 : i32
    %5 = arith.muli %arg0, %c4_i32 : i32
    %6 = arith.addi %5, %arg1 : i32
    %7 = arith.index_cast %6 : i32 to index
    %8 = memref.load %arg4[%7] : memref<4xi32, #tpu.memory_space<smem>>
    %9 = arith.cmpi slt, %arg2, %8 : i32
    %10 = arith.extui %9 : i1 to i32
    %c0_i32_2 = arith.constant 0 : i32
    %11 = arith.cmpi ne, %10, %c0_i32_2 : i32
    scf.if %11 {
      %c0 = arith.constant 0 : index
      %c0_5 = arith.constant 0 : index
      %17 = vector.load %arg6[%c0, %c0_5] : memref<256x32xbf16, #tpu.memory_space<vmem>>, vector<256x32xbf16>
      %c0_6 = arith.constant 0 : index
      %c0_7 = arith.constant 0 : index
      %c0_8 = arith.constant 0 : index
      %18 = vector.load %arg7[%c0_6, %c0_7, %c0_8] : memref<1x32x128xbf16, #tpu.memory_space<vmem>>, vector<1x32x128xbf16>
      %19 = vector.shape_cast %18 : vector<1x32x128xbf16> to vector<32x128xbf16>
      %cst = arith.constant dense<0.000000e+00> : vector<256x128xf32>
      %20 = tpu.matmul %17, %19, %cst {dimension_numbers = #tpu.dot_dimension_numbers<[1], [0], [0], [1], [0, 0, 1, 1], [], []>} : vector<256x32xbf16>, vector<32x128xbf16>, vector<256x128xf32> -> vector<256x128xf32>
      %c0_9 = arith.constant 0 : index
      %c0_10 = arith.constant 0 : index
      %21 = vector.load %arg10[%c0_9, %c0_10] : memref<256x128xf32, #tpu.memory_space<vmem>>, vector<256x128xf32>
      %c0_11 = arith.constant 0 : index
      %c0_12 = arith.constant 0 : index
      %c0_13 = arith.constant 0 : index
      %22 = vector.load %arg5[%c0_11, %c0_12, %c0_13] : memref<1x256x256xbf16, #tpu.memory_space<vmem>>, vector<1x256x256xbf16>
      %23 = vector.shape_cast %22 : vector<1x256x256xbf16> to vector<256x256xbf16>
      %24 = arith.truncf %20 : vector<256x128xf32> to vector<256x128xbf16>
      %cst_14 = arith.constant dense<0.000000e+00> : vector<256x128xf32>
      %25 = tpu.matmul %23, %24, %cst_14 {dimension_numbers = #tpu.dot_dimension_numbers<[1], [0], [0], [1], [0, 0, 1, 1], [], []>} : vector<256x256xbf16>, vector<256x128xbf16>, vector<256x128xf32> -> vector<256x128xf32>
      %26 = arith.addf %21, %25 : vector<256x128xf32>
      %c0_15 = arith.constant 0 : index
      %c0_16 = arith.constant 0 : index
      %27 = vector.load %arg10[%c0_15, %c0_16] : memref<256x128xf32, #tpu.memory_space<vmem>>, vector<256x128xf32>
      tpu.vector_store %arg10[%c0_15, %c0_16], %26 {strides = array<i32>} : memref<256x128xf32, #tpu.memory_space<vmem>>, vector<256x128xf32>,
    } else {
    }
    %c3_i32 = arith.constant 3 : i32
    %12 = arith.cmpi eq, %arg1, %c3_i32 : i32
    %c0_i32_3 = arith.constant 0 : i32
    %13 = arith.cmpi eq, %arg2, %c0_i32_3 : i32
    %14 = arith.andi %12, %13 : i1
    %15 = arith.extui %14 : i1 to i32
    %c0_i32_4 = arith.constant 0 : i32
    %16 = arith.cmpi ne, %15, %c0_i32_4 : i32
    scf.if %16 {
      %c0 = arith.constant 0 : index
      %c0_5 = arith.constant 0 : index
      %17 = vector.load %arg10[%c0, %c0_5] : memref<256x128xf32, #tpu.memory_space<vmem>>, vector<256x128xf32>
      %c0_6 = arith.constant 0 : index
      %c0_7 = arith.constant 0 : index
      %18 = vector.load %arg8[%c0_6, %c0_7] : memref<1x128xf32, #tpu.memory_space<vmem>>, vector<1x128xf32>
      %19 = vector.broadcast %18 : vector<1x128xf32> to vector<256x128xf32>
      %20 = arith.addf %17, %19 : vector<256x128xf32>
      %cst = arith.constant 0.000000e+00 : f32
      %21 = vector.broadcast %cst : f32 to vector<256x128xf32>
      %22 = arith.maximumf %20, %21 : vector<256x128xf32>
      %23 = arith.truncf %22 : vector<256x128xf32> to vector<256x128xbf16>
      %c0_8 = arith.constant 0 : index
      %c0_9 = arith.constant 0 : index
      %24 = vector.load %arg9[%c0_8, %c0_9] : memref<256x128xbf16, #tpu.memory_space<vmem>>, vector<256x128xbf16>
      tpu.vector_store %arg9[%c0_8, %c0_9], %23 {strides = array<i32>} : memref<256x128xbf16, #tpu.memory_space<vmem>>, vector<256x128xbf16>,
    } else {
    }
    return
  }
  func.func @transform_0(%arg0: i32, %arg1: i32, %arg2: i32, %arg3: memref<4xi32, #tpu.memory_space<smem>>, %arg4: memref<4xi32, #tpu.memory_space<smem>>) -> (i32, i32, i32) {
    %c4_i32 = arith.constant 4 : i32
    %0 = arith.muli %arg0, %c4_i32 : i32
    %1 = arith.addi %0, %arg1 : i32
    %c1_i32 = arith.constant 1 : i32
    %2 = arith.muli %1, %c1_i32 : i32
    %3 = arith.addi %2, %arg2 : i32
    %4 = arith.index_cast %3 : i32 to index
    %5 = memref.load %arg3[%4] : memref<4xi32, #tpu.memory_space<smem>>
    %c0_i32 = arith.constant 0 : i32
    return %arg1, %arg0, %5 : i32, i32, i32
  }
  func.func @transform_1(%arg0: i32, %arg1: i32, %arg2: i32, %arg3: memref<4xi32, #tpu.memory_space<smem>>, %arg4: memref<4xi32, #tpu.memory_space<smem>>) -> (i32, i32) {
    %c4_i32 = arith.constant 4 : i32
    %0 = arith.muli %arg0, %c4_i32 : i32
    %1 = arith.addi %0, %arg1 : i32
    %c1_i32 = arith.constant 1 : i32
    %2 = arith.muli %1, %c1_i32 : i32
    %3 = arith.addi %2, %arg2 : i32
    %4 = arith.index_cast %3 : i32 to index
    %5 = memref.load %arg3[%4] : memref<4xi32, #tpu.memory_space<smem>>
    %c0_i32 = arith.constant 0 : i32
    %c0_i32_0 = arith.constant 0 : i32
    return %5, %c0_i32 : i32, i32
  }
  func.func @transform_2(%arg0: i32, %arg1: i32, %arg2: i32, %arg3: memref<4xi32, #tpu.memory_space<smem>>, %arg4: memref<4xi32, #tpu.memory_space<smem>>) -> (i32, i32, i32) {
    %c0_i32 = arith.constant 0 : i32
    %c0_i32_0 = arith.constant 0 : i32
    %c0_i32_1 = arith.constant 0 : i32
    return %arg1, %c0_i32, %c0_i32_0 : i32, i32, i32
  }
  func.func @transform_3(%arg0: i32, %arg1: i32, %arg2: i32, %arg3: memref<4xi32, #tpu.memory_space<smem>>, %arg4: memref<4xi32, #tpu.memory_space<smem>>) -> (i32, i32) {
    %c0_i32 = arith.constant 0 : i32
    %c0_i32_0 = arith.constant 0 : i32
    %c0_i32_1 = arith.constant 0 : i32
    return %c0_i32, %c0_i32_0 : i32, i32
  }
  func.func @transform_4(%arg0: i32, %arg1: i32, %arg2: i32, %arg3: memref<4xi32, #tpu.memory_space<smem>>, %arg4: memref<4xi32, #tpu.memory_space<smem>>) -> (i32, i32) {
    %c0_i32 = arith.constant 0 : i32
    %c0_i32_0 = arith.constant 0 : i32
    return %arg0, %c0_i32 : i32, i32
  }
}

</mosaic_0001>

<bundles_post_ra>
// kernel: tpu_custom_call.1
= control target key start
LH: loop header
LB: loop body
LE: loop exit
PB: predicated region body
PF: predicated region fallthrough
CT: control target
= control target key end

     0   :  { %s2592_s0 = inlined_call_operand.vmem [shape: s32[4], index: 0, kind: input, shape index: {}]   ;;  %s2593_s2 = inlined_call_operand.hbm [shape: bf16[4,256,256], index: 2, kind: input, shape index: {}]   ;;  %s2594_s3 = inlined_call_operand.vmem [shape: bf16[256,32], index: 3, kind: input, shape index: {}]   ;;  %s2595_s4 = inlined_call_operand.vmem [shape: bf16[4,32,128], index: 4, kind: input, shape index: {}]   ;;  %s2596_s5 = inlined_call_operand.vmem [shape: f32[1,128], index: 5, kind: input, shape index: {}]   ;;  %s2597_s6 = inlined_call_operand.hbm [shape: bf16[256,128], index: 6, kind: output, shape index: {}]   ;;  %s2598_s1 = inlined_call_operand.vmem [shape: s32[4], index: 1, kind: input, shape index: {}]  }
   0x1   :  { %s11_s23 = sshll.u32 %s2592_s0, 4  ;;  %s15_s26 = sshll.u32 %s2598_s1, 4  ;;  %s12_s23 = int_to_ptr.vmem [resolvable:$true] %s11_s23  ;;  %s16_s26 = int_to_ptr.vmem [resolvable:$true] %s15_s26 }
   0x2   :  { %s2131_s27 = scalar_lea.vmem %s12_s23, 16  ;;  %p2136_p1 = scmp.lt.s32.totalorder %s12_s23, %s12_s23 }
   0x3   :  { %p2132_p0 = scmp.ne.s32.totalorder %s12_s23, %s2131_s27  ;;  %p2137_p2 = scmp.lt.s32.totalorder %s2131_s27, %s2131_s27 }
   0x5   :  { %p2138_p3 = por %p2137_p2, %p2136_p1 }
   0x7   :  { %p2139_p4 = pnand %p2138_p3, %p2132_p0 }
   0x9   :  { %2142 = shalt.err (!%p2139_p4)  }
   0xa   :  { %s2269_s28 = smov [#allocation4]   ;;  %s2143_s29 = scalar_lea.vmem %s16_s26, 16 }
   0xb   :  { %14 = dma.vmem_to_smem %s12_s23, 16, %s2269_s28, [#allocation3] }
   0xc   :  { %p2144_p5 = scmp.ne.s32.totalorder %s16_s26, %s2143_s29  ;;  %p2148_p6 = scmp.lt.s32.totalorder %s16_s26, %s16_s26 }
   0xd   :  { %p2149_p7 = scmp.lt.s32.totalorder %s2143_s29, %s2143_s29 }
   0xf   :  { %p2150_p8 = por %p2149_p7, %p2148_p6 }
  0x11   :  { %p2151_p9 = pnand %p2150_p8, %p2144_p5 }
  0x13   :  { %2154 = shalt.err (!%p2151_p9)  }
  0x14   :  { %s2270_s0 = smov [#allocation5]  }
  0x15   :  { %18 = dma.vmem_to_smem %s16_s26, 16, %s2270_s0, [#allocation3] }
  0x16   :  { %2235 = dma.done.wait [#allocation3], 32 }
  0x17   :  { %2236 = vsyncadd [#allocation3], 4294967264 }
  0x18   :  { %20 = sfence }
  0x19   :  { %21 = vsyncpa [#allocation7], 0 }
  0x1a   :  { %23 = vsyncpa [#allocation7 + $0x1], 0 }
  0x1b   :  { %24 = vsyncpa [#allocation8], 0  ;;  %s2319_s1 = smov 0   ;;  %s2321_s30 = smov 0  }
  0x1c   :  { %s2323_s7 = smov 0   ;;  %s2325_s8 = smov 0  }
  0x1d   :  { %s2327_s9 = smov 0   ;;  %s2329_s10 = smov 0  }
  0x1e LB: > { %s45_s11 = sadd.s32 1, %s2263_s9  ;;  %s1560_s12 = sadd.s32 4294967295, %s2267_s10   ;;  %s2267_s10 = sphi %s2329_s10, %s30_s10   ;;  %s2263_s9 = sphi %s2327_s9, %s2609_s9   ;;  %s2259_s8 = sphi %s2325_s8, %s2608_s8   ;;  %s2255_s7 = sphi %s2323_s7, %s2607_s7   ;;  %s2251_s30 = sphi %s2321_s30, %s2606_s30   ;;  %s2247_s1 = sphi %s2319_s1, %s2605_s1  }
  0x1f   : > { %p47_p10 = scmp.ge.s32.totalorder %s45_s11, 4  ;;  %s56_s13 = sld [smem:[#allocation4 + %s2263_s9]] }
  0x20   : > { %p81_p11 = scmp.ne.s32.totalorder %s2251_s30, %s2247_s1  ;;  %p75_p12 = scmp.ne.s32.totalorder %s2255_s7, %s2251_s30 }
  0x21   : > { %s2611_s11 = smov (%p47_p10, %s45_s11), 0  ;;  %p76_p13 = scmp.eq.s32.totalorder %s2267_s10, 0 }
  0x22   : > { %s60_s14 = sld [smem:[#allocation4 + %s2611_s11]]  ;;  %p82_p0 = scmp.eq.s32.totalorder %s1560_s12, 0 }
  0x23   : > { %s61_s16 = ssub.s32 %s2263_s9, %s2611_s11  ;;  %s215_s17 = sand.u32 1, %s2255_s7  }
  0x24   : > { %p2359_p1 = por %p82_p0, %p81_p11  ;;  %s68_s18 = sadd.s32 1, %s2255_s7 }
  0x25   : > { %p77_p2 = por %p76_p13, %p75_p12  ;;  %p2006_p3 = scmp.lt.s32.totalorder %s2267_s10, 4 }
  0x26   : > { %s2600_s15 = scalar_select %p2359_p1, 1, 0 }
  0x27   : > { %s1563_s21 = sshll.u32 %s215_s17, 8  ;;  %p2368_p5 = pnand %p2006_p3, %p77_p2 }
  0x28   : > { %s64_s19 = ssub.s32 %s56_s13, %s60_s14  ;;  %p1567_p6 = scmp.ge.s32.totalorder %s2267_s10, 1 }
  0x29   : > { %s65_s20 = sor.u32 %s64_s19, %s61_s16  ;;  %p268_p7 = scmp.lt.s32.totalorder %s2267_s10, 5 }
  0x2a   : > { %p66_p4 = scmp.eq.s32.totalorder %s65_s20, 0  ;;  %s219_s27 = scalar_lea.vmem [#allocation6], %s1563_s21 }
  0x2b   : > { %s1992_s23 = scalar_select %p77_p2, [#allocation4], [#allocation10] }
  0x2c   : > { %s2373_s24 = scalar_select %p66_p4, %s2255_s7, %s68_s18  }
  0x2d   : > { %s1993_s25 = scalar_select %p77_p2, %s2263_s9, 0 }
  0x2e   : > { %s2613_s23 = smov (!%p2006_p3, %s1992_s23), [#allocation11]  ;;  %s235_s28 = sshll.u32 %s219_s27, 4  ;;  %s2383_s28 = int_to_ptr.vmem [resolvable:$true] %s235_s28 }
  0x2f   : > { %s2615_s25 = smov (!%p2006_p3, %s1993_s25), 0  ;;  %p2378_p8 = pnand %p1567_p6, %p268_p7 }
  0x30   : > { %s223_s26 = sld [smem:[%s2613_s23 + %s2615_s25]]  ;;  %s1565_s0 = sshll.u32 %s2263_s9, 6 }
  0x31   : > { %s2390_s20 = scalar_lea.sflag [#allocation7], %s215_s17  ;;  %p2157_p10 = pneg %p2368_p5 }
  0x36   : > { %s1564_s1 = sshll.u32 %s223_s26, 1  ;;  %s2160_s26 = scalar_lea.hbm %s2593_s2, 16384 }
  0x37   : > { %s232_s13 = sadd.s32 %s1565_s0, %s1564_s1 }
  0x38   : > { %s1566_s14 = sshll.u32 %s232_s13, 6 }
  0x39   : > { %s2388_s19 = scalar_lea.hbm %s2593_s2, %s1566_s14 }
  0x3a   : > { %s2155_s21 = scalar_lea.hbm %s2388_s19, 4096  ;;  %p2161_p13 = scmp.lt.u32.totalorder %s2388_s19, %s2593_s2 }
  0x3b   : > { %p2156_p9 = scmp.ne.s32.totalorder %s2388_s19, %s2155_s21  ;;  %p2162_p0 = scmp.lt.u32.totalorder %s2160_s26, %s2155_s21 }
  0x3c   : > { %p2164_p3 = scmp.lt.u32.totalorder %s2155_s21, %s2388_s19 }
  0x3d   : > { %p2158_p11 = pnand %p2157_p10, %p2156_p9  ;;  %p2163_p2 = por %p2162_p0, %p2161_p13 }
  0x3f   : > { %p2159_p12 = pneg %p2158_p11  ;;  %p2165_p4 = por %p2164_p3, %p2163_p2 }
  0x41   : > { %p2166_p6 = pnand %p2165_p4, %p2159_p12 }
  0x43   : > { %2169 = shalt.err (!%p2166_p6)
}
  0x44   : > { %s2170_s17 = scalar_lea.vmem %s2383_s28, 4096  ;;  %s2271_s1 = smov [#allocation6]  }
  0x45   : > { %p2171_p7 = scmp.ne.s32.totalorder %s2383_s28, %s2170_s17  ;;  %s2175_s13 = sshll.u32 %s2271_s1, 4  ;;  %s2176_s13 = int_to_ptr.vmem [resolvable:$false] %s2175_s13 }
  0x46   : > { %s2177_s14 = scalar_lea.vmem %s2176_s13, 8192  ;;  %p2178_p1 = scmp.lt.s32.totalorder %s2383_s28, %s2176_s13 }
  0x47   : > { %p2173_p9 = pnand %p2171_p7, %p2157_p10  ;;  %p2179_p13 = scmp.lt.s32.totalorder %s2177_s14, %s2170_s17 }
  0x49   : > { %p2174_p11 = pneg %p2173_p9  ;;  %p2180_p0 = por %p2179_p13, %p2178_p1 }
  0x4b   : > { %p2181_p2 = pnand %p2180_p0, %p2174_p11 }
  0x4d   : > { %2184 = shalt.err (!%p2181_p2)
}
  0x4e   : > { %s2272_s16 = smov 128   ;;  %s2273_s18 = smov 8  }
  0x4f   : > { %2005 = dma.hbm_to_vmem [thread:$0]  (!%p2368_p5), %s2388_s19, 4096, %s2383_s28, %s2390_s20, %s2272_s16, %s2272_s16, %s2273_s18  }
  0x50   : > { %272 = sbr.rel (%p2378_p8) target bundleno = 757 (0x2f5), region = 36  ;;  %s274_s21 = sand.u32 (!%p2378_p8), 1, %s2251_s30  }
  0x51   : > { %s1568_s23 = sshll.u32 (!%p2378_p8), %s274_s21, 8  ;;  %s275_s25 = scalar_lea.sflag (!%p2378_p8), [#allocation7], %s274_s21 }
  0x52   : > { %s2421_s26 = scalar_lea.vmem (!%p2378_p8), [#allocation6], %s1568_s23  ;;  %p2603_p1 = scmp.ne.s32.totalorder (!%p2378_p8), %s2600_s15, 0 }
  0x57   : > { %2238 = dma.done.wait (%p2603_p1), %s275_s25, 4096  }
  0x58   : > { %2240 = vsyncadd (%p2603_p1), %s275_s25, 4294963200  ;;  %p332_p5 = scmp.lt.s32.totalorder %s2259_s8, 3  ;;  %p339_p10 = scmp.eq.s32.totalorder %s2259_s8, 0 }
  0x59   : > { %s321_s22 = sld [smem:[#allocation4 + %s2259_s8]]  ;;  %v2274_v0 = vmov (%p339_p10), 0.0  }
  0x5a   : > { %s333_s28 = scalar_select %p332_p5, %s2259_s8, 3 }
  0x5b   : > { %345 = vst [vmem:[#allocation2] sm:$0xff] (%p339_p10), %v2274_v0  ;;  %346 = vst [vmem:[#allocation2 + $0x8] sm:$0xff] (%p339_p10), %v2274_v0 }
  0x5c   : > { %s1680_s29 = sshll.u32 %s333_s28, 4  ;;  %347 = vst [vmem:[#allocation2 + $0x10] sm:$0xff] (%p339_p10), %v2274_v0  ;;  %348 = vst [vmem:[#allocation2 + $0x18] sm:$0xff] (%p339_p10), %v2274_v0 }
  0x5d   : > { %s2434_s27 = scalar_lea.vmem %s2595_s4, %s1680_s29  ;;  %349 = vst [vmem:[#allocation2 + $0x20] sm:$0xff] (%p339_p10), %v2274_v0  ;;  %350 = vst [vmem:[#allocation2 + $0x28] sm:$0xff] (%p339_p10), %v2274_v0 }
  0x5e   : > { %344 = sbr.rel (!%p339_p10) target bundleno = 107 (0x6b), region = 44  ;;  %351 = vst [vmem:[#allocation2 + $0x30] sm:$0xff] (%p339_p10), %v2274_v0  ;;  %352 = vst [vmem:[#allocation2 + $0x38] sm:$0xff] (%p339_p10), %v2274_v0 }
  0x5f   : > { %s1569_s0 = sshll.u32 %s321_s22, 5  ;;  %353 = vst [vmem:[#allocation2 + $0x40] sm:$0xff] (%p339_p10), %v2274_v0  ;;  %354 = vst [vmem:[#allocation2 + $0x48] sm:$0xff] (%p339_p10), %v2274_v0 }
  0x60   : > { %p323_p8 = scmp.lt.s32.totalorder %s1569_s0, 31  ;;  %355 = vst [vmem:[#allocation2 + $0x50] sm:$0xff] (%p339_p10), %v2274_v0  ;;  %356 = vst [vmem:[#allocation2 + $0x58] sm:$0xff] (%p339_p10), %v2274_v0 }
  0x61   : > { %357 = vst [vmem:[#allocation2 + $0x60] sm:$0xff] (%p339_p10), %v2274_v0  ;;  %358 = vst [vmem:[#allocation2 + $0x68] sm:$0xff] (%p339_p10), %v2274_v0 }
  0x62   : > { %s2617_s0 = smov (!%p323_p8, %s1569_s0), 31  ;;  %359 = vst [vmem:[#allocation2 + $0x70] sm:$0xff] (%p339_p10), %v2274_v0  ;;  %360 = vst [vmem:[#allocation2 + $0x78] sm:$0xff] (%p339_p10), %v2274_v0 }
  0x63   : > { %s1570_s17 = sshll.u32 %s2617_s0, 2  ;;  %361 = vst [vmem:[#allocation2 + $0x80] sm:$0xff] (%p339_p10), %v2274_v0  ;;  %362 = vst [vmem:[#allocation2 + $0x88] sm:$0xff] (%p339_p10), %v2274_v0 }
  0x64   : > { %s2439_s13 = scalar_lea.vmem %s2594_s3, %s1570_s17  ;;  %363 = vst [vmem:[#allocation2 + $0x90] sm:$0xff] (%p339_p10), %v2274_v0  ;;  %364 = vst [vmem:[#allocation2 + $0x98] sm:$0xff] (%p339_p10), %v2274_v0 }
  0x65   : > { %365 = vst [vmem:[#allocation2 + $0xa0] sm:$0xff] %v2274_v0  ;;  %366 = vst [vmem:[#allocation2 + $0xa8] sm:$0xff] %v2274_v0 }
  0x66   : > { %367 = vst [vmem:[#allocation2 + $0xb0] sm:$0xff] %v2274_v0  ;;  %368 = vst [vmem:[#allocation2 + $0xb8] sm:$0xff] %v2274_v0 }
  0x67   : > { %369 = vst [vmem:[#allocation2 + $0xc0] sm:$0xff] %v2274_v0  ;;  %370 = vst [vmem:[#allocation2 + $0xc8] sm:$0xff] %v2274_v0 }
  0x68   : > { %371 = vst [vmem:[#allocation2 + $0xd0] sm:$0xff] %v2274_v0  ;;  %372 = vst [vmem:[#allocation2 + $0xd8] sm:$0xff] %v2274_v0 }
  0x69   : > { %373 = vst [vmem:[#allocation2 + $0xe0] sm:$0xff] %v2274_v0  ;;  %374 = vst [vmem:[#allocation2 + $0xe8] sm:$0xff] %v2274_v0 }
  0x6a   : > { %375 = vst [vmem:[#allocation2 + $0xf0] sm:$0xff] %v2274_v0  ;;  %376 = vst [vmem:[#allocation2 + $0xf8] sm:$0xff] %v2274_v0 }
  0x6b PF: > { %s379_s14 = sld [smem:[#allocation5 + %s2259_s8]] }
  0x71   : > { %p1575_p12 = scmp.le.s32.totalorder %s379_s14, 0 }
  0x72   : > { %v2065_v1 = vld [vmem:[%s2434_s27] sm:$0xff] (!%p1575_p12)   ;;  %v2066_v2 = vld [vmem:[%s2434_s27 + $0x8] sm:$0xff] (!%p1575_p12)   ;;  %vm512_vm0 = vcmask (!%p1575_p12), 261120   ;;  %v2069_v5 = vld [vmem:[%s2439_s13 + $0x10] sm:$0xff] (!%p1575_p12)  }
  0x73   : > { %383 = sbr.rel (%p1575_p12) target bundleno = 704 (0x2c0), region = 48  ;;  %1940 = vmatprep.subr.bf16.mxu0 (!%p1575_p12), %v2065_v1  ;;  %v2067_v3 = vld [vmem:[%s2439_s13] sm:$0xff] (!%p1575_p12)   ;;  %v2068_v4 = vld [vmem:[%s2439_s13 + $0x8] sm:$0xff] (!%p1575_p12)   ;;  %v2070_v6 = vld [vmem:[%s2439_s13 + $0x18] sm:$0xff] (!%p1575_p12)  }
  0x74   : > { %1941 = vmatpush3.bf16.msra.mxu0 (!%p1575_p12), %v2065_v1  ;;  %1944 = vmatprep.mubr.msk.bf16.mxu0 (!%p1575_p12), %vm512_vm0, %v2067_v3  ;;  %v2071_v7 = vld [vmem:[%s2439_s13 + $0x20] sm:$0xff] (!%p1575_p12)   ;;  %v2072_v8 = vld [vmem:[%s2439_s13 + $0x28] sm:$0xff] (!%p1575_p12)   ;;  %v2073_v9 = vld [vmem:[%s2439_s13 + $0x30] sm:$0xff] (!%p1575_p12)  }
  0x75   : > { %1942 = vmatprep.subr.bf16.mxu0 (!%p1575_p12), %v2066_v2  ;;  %v2074_v10 = vld [vmem:[%s2439_s13 + $0x38] sm:$0xff] (!%p1575_p12)   ;;  %v2075_v11 = vld [vmem:[%s2439_s13 + $0x40] sm:$0xff] (!%p1575_p12)   ;;  %v2076_v12 = vld [vmem:[%s2439_s13 + $0x48] sm:$0xff] (!%p1575_p12)  }
  0x76   : > { %v2077_v13 = vld [vmem:[%s2439_s13 + $0x50] sm:$0xff] (!%p1575_p12)   ;;  %v2078_v14 = vld [vmem:[%s2439_s13 + $0x58] sm:$0xff] (!%p1575_p12)   ;;  %v2079_v15 = vld [vmem:[%s2439_s13 + $0x60] sm:$0xff] (!%p1575_p12)  }
  0x77   : > { %v2080_v16 = vld [vmem:[%s2439_s13 + $0x68] sm:$0xff] (!%p1575_p12)   ;;  %v2081_v17 = vld [vmem:[%s2439_s13 + $0x70] sm:$0xff] (!%p1575_p12)   ;;  %v2082_v18 = vld [vmem:[%s2439_s13 + $0x78] sm:$0xff] (!%p1575_p12)  }
  0x78   : > { %1943 = vmatpush3.bf16.msra.mxu0 (!%p1575_p12), %v2066_v2  ;;  %v2085_v19 = vld [vmem:[%s2421_s26 + $0x54] ss:$8 sps:$4 sm:$0xff] (!%p1575_p12)   ;;  %v2103_v20 = vld [vmem:[%s2421_s26 + $0x4] ss:$8 sps:$4 sm:$0xff] (!%p1575_p12)  }
  0x79   : > { %1034 = vmatprep.mubr.bf16.mxu1 (!%p1575_p12), %v2085_v19  ;;  %v2095_v19 = vld [vmem:[%s2421_s26 + $0x94] ss:$8 sps:$4 sm:$0xff] (!%p1575_p12)  }
  0x7b   : > { %1945 = vmatmul.mubr.msk.bf16.vlgmr.msra.gmra.mrb[0].mxu0 %vm512_vm0, %v2068_v4 }
  0x7c   : > { %1948 = vmatprep.mubr.msk.bf16.mxu0 %vm512_vm0, %v2069_v5  ;;  %v2083_v5 = vld [vmem:[%s2421_s26 + $0x50] ss:$8 sps:$4 sm:$0xff]  }
  0x83   : > { %1949 = vmatmul.mubr.msk.bf16.gmra.mrb[4].mxu0 %vm512_vm0, %v2070_v6  ;;  %v2101_v6 = vld [vmem:[%s2421_s26] ss:$8 sps:$4 sm:$0xff]  }
  0x84   : > { %1952 = vmatprep.mubr.msk.bf16.mxu0 %vm512_vm0, %v2071_v7  ;;  %v2086_v7 = vld [vmem:[%s2421_s26 + $0x64] ss:$8 sps:$4 sm:$0xff]  }
  0x8b   : > { %1953 = vmatmul.mubr.msk.bf16.gmra.mrb[8].mxu0 %vm512_vm0, %v2072_v8  ;;  %v2107_v8 = vld [vmem:[%s2421_s26 + $0x14] ss:$8 sps:$4 sm:$0xff]  }
  0x8c   : > { %1956 = vmatprep.mubr.msk.bf16.mxu0 %vm512_vm0, %v2073_v9  ;;  %v2088_v9 = vld [vmem:[%s2421_s26 + $0x60] ss:$8 sps:$4 sm:$0xff]  }
  0x93   : > { %1957 = vmatmul.mubr.msk.bf16.gmra.mrb[12].mxu0 %vm512_vm0, %v2074_v10  ;;  %v2109_v10 = vld [vmem:[%s2421_s26 + $0x10] ss:$8 sps:$4 sm:$0xff]  }
  0x94   : > { %1960 = vmatprep.mubr.msk.bf16.mxu0 %vm512_vm0, %v2075_v11  ;;  %v2089_v11 = vld [vmem:[%s2421_s26 + $0x74] ss:$8 sps:$4 sm:$0xff]  }
  0x9b   : > { %1961 = vmatmul.mubr.msk.bf16.gmra.mrb[16].mxu0 %vm512_vm0, %v2076_v12  ;;  %v2113_v12 = vld [vmem:[%s2421_s26 + $0x24] ss:$8 sps:$4 sm:$0xff]  }
  0x9c   : > { %1964 = vmatprep.mubr.msk.bf16.mxu0 %vm512_vm0, %v2077_v13  ;;  %v2091_v13 = vld [vmem:[%s2421_s26 + $0x70] ss:$8 sps:$4 sm:$0xff]  }
  0xa3   : > { %1965 = vmatmul.mubr.msk.bf16.gmra.mrb[20].mxu0 %vm512_vm0, %v2078_v14  ;;  %v2115_v14 = vld [vmem:[%s2421_s26 + $0x20] ss:$8 sps:$4 sm:$0xff]  }
  0xa4   : > { %1968 = vmatprep.mubr.msk.bf16.mxu0 %vm512_vm0, %v2079_v15  ;;  %v2092_v15 = vld [vmem:[%s2421_s26 + $0x84] ss:$8 sps:$4 sm:$0xff]  }
  0xab   : > { %1969 = vmatmul.mubr.msk.bf16.gmra.mrb[24].mxu0 %vm512_vm0, %v2080_v16  ;;  %v2119_v16 = vld [vmem:[%s2421_s26 + $0x34] ss:$8 sps:$4 sm:$0xff]  }
  0xac   : > { %1972 = vmatprep.mubr.msk.bf16.mxu0 %vm512_vm0, %v2081_v17  ;;  %v2094_v17 = vld [vmem:[%s2421_s26 + $0x80] ss:$8 sps:$4 sm:$0xff]  }
  0xb3   : > { %1973 = vmatmul.mubr.msk.bf16.gmra.mrb[28].mxu0 %vm512_vm0, %v2082_v18  ;;  %v2121_v18 = vld [vmem:[%s2421_s26 + $0x30] ss:$8 sps:$4 sm:$0xff]  }
  0xb4   : > { %994 = vmatprep.mubr.bf16.mxu0 %v2103_v20  ;;  %v2125_v20 = vld [vmem:[%s2421_s26 + $0x44] ss:$8 sps:$4 sm:$0xff]  }
 0x14e   : > { %v1946_v21 = vpop.f32.mrb[0].mxu0 }
 0x14f   : > { %v595_v22 = vpop.f32.mrb[1].mxu0 }
 0x150   : > { %v1947_v23 = vpop.f32.mrb[2].mxu0 }
 0x151   : > { %v787_v24 = vpack.c.bf16 %v1947_v23, %v1946_v21  ;;  %v598_v25 = vpop.f32.mrb[3].mxu0  ;;  %v2097_v21 = vld [vmem:[%s2421_s26 + $0x90] ss:$8 sps:$4 sm:$0xff]   ;;  %v2098_v23 = vld [vmem:[%s2421_s26 + $0xa4] ss:$8 sps:$4 sm:$0xff]  }
 0x152   : > { %v786_v26 = vpack.c.bf16 %v598_v25, %v595_v22  ;;  %v2127_v22 = vld [vmem:[%s2421_s26 + $0x40] ss:$8 sps:$4 sm:$0xff]   ;;  %v2104_v25 = vld [vmem:[%s2421_s26 + $0xb4] ss:$8 sps:$4 sm:$0xff]  }
 0x156   : > { %v1950_v27 = vpop.f32.mrb[4].mxu0 }
 0x157   : > { %v611_v28 = vpop.f32.mrb[5].mxu0 }
 0x158   : > { %v1951_v29 = vpop.f32.mrb[6].mxu0 }
 0x159   : > { %v789_v30 = vpack.c.bf16 %v1951_v29, %v1950_v27  ;;  %v614_v31 = vpop.f32.mrb[7].mxu0  ;;  %v2110_v27 = vld [vmem:[%s2421_s26 + $0xc4] ss:$8 sps:$4 sm:$0xff]   ;;  %v2116_v29 = vld [vmem:[%s2421_s26 + $0xd4] ss:$8 sps:$4 sm:$0xff]  }
 0x15a   : > { %v788_v32 = vpack.c.bf16 %v614_v31, %v611_v28  ;;  %v2112_v28 = vld [vmem:[%s2421_s26 + $0xc0] ss:$8 sps:$4 sm:$0xff]   ;;  %v2122_v31 = vld [vmem:[%s2421_s26 + $0xe4] ss:$8 sps:$4 sm:$0xff]  }
 0x15e   : > { %v1954_v33 = vpop.f32.mrb[8].mxu0 }
 0x15f   : > { %v627_v34 = vpop.f32.mrb[9].mxu0 }
 0x160   : > { %v1955_v35 = vpop.f32.mrb[10].mxu0 }
 0x161   : > { %v791_v36 = vpack.c.bf16 %v1955_v35, %v1954_v33  ;;  %v630_v37 = vpop.f32.mrb[11].mxu0  ;;  %v2128_v33 = vld [vmem:[%s2421_s26 + $0xf4] ss:$8 sps:$4 sm:$0xff]  }
 0x162   : > { %v790_v38 = vpack.c.bf16 %v630_v37, %v627_v34  ;;  %v2130_v34 = vld [vmem:[%s2421_s26 + $0xf0] ss:$8 sps:$4 sm:$0xff]  }
 0x163   : > { %v732_v37 = vld [vmem:[#allocation2 + $0x50] sm:$0xff] }
 0x166   : > { %v1958_v39 = vpop.f32.mrb[12].mxu0 }
 0x167   : > { %v643_v40 = vpop.f32.mrb[13].mxu0 }
 0x168   : > { %v1959_v41 = vpop.f32.mrb[14].mxu0 }
 0x169   : > { %v793_v42 = vpack.c.bf16 %v1959_v41, %v1958_v39  ;;  %v646_v43 = vpop.f32.mrb[15].mxu0  ;;  %v722_v39 = vld [vmem:[#allocation2] sm:$0xff] }
 0x16a   : > { %v792_v44 = vpack.c.bf16 %v646_v43, %v643_v40 }
 0x16e   : > { %v1962_v45 = vpop.f32.mrb[16].mxu0 }
 0x16f   : > { %v659_v46 = vpop.f32.mrb[17].mxu0 }
 0x170   : > { %v1963_v47 = vpop.f32.mrb[18].mxu0 }
 0x171   : > { %v795_v48 = vpack.c.bf16 %v1963_v47, %v1962_v45  ;;  %v662_v49 = vpop.f32.mrb[19].mxu0  ;;  %v733_v45 = vld [vmem:[#allocation2 + $0x58] sm:$0xff]  ;;  %v723_v47 = vld [vmem:[#allocation2 + $0x8] sm:$0xff] }
 0x172   : > { %v794_v50 = vpack.c.bf16 %v662_v49, %v659_v46 }
 0x174   : > { %1828 = vmatprep.subr.bf16.mxu0 %v794_v50  ;;  %1976 = vmatprep.subr.bf16.mxu1 %v794_v50 }
 0x175   : > { %1829 = vmatpush3.bf16.msra.mxu0 %v786_v26  ;;  %1984 = vmatpush3.bf16.msra.mxu1 %v786_v26  ;;  %v2106_v26 = vld [vmem:[%s2421_s26 + $0xb0] ss:$8 sps:$4 sm:$0xff]  }
 0x176   : > { %v1966_v51 = vpop.f32.mrb[20].mxu0  ;;  %1830 = vmatprep.subr.bf16.mxu0 %v795_v48  ;;  %1977 = vmatprep.subr.bf16.mxu1 %v795_v48 }
 0x177   : > { %v675_v52 = vpop.f32.mrb[21].mxu0 }
 0x178   : > { %v1967_v53 = vpop.f32.mrb[22].mxu0 }
 0x179   : > { %v797_v54 = vpack.c.bf16 %v1967_v53, %v1966_v51  ;;  %v678_v55 = vpop.f32.mrb[23].mxu0  ;;  %1831 = vmatpush3.bf16.msra.mxu0 %v787_v24  ;;  %1985 = vmatpush3.bf16.msra.mxu1 %v787_v24  ;;  %v2100_v24 = vld [vmem:[%s2421_s26 + $0xa0] ss:$8 sps:$4 sm:$0xff]  }
 0x17a   : > { %v796_v56 = vpack.c.bf16 %v678_v55, %v675_v52 }
 0x17c   : > { %1832 = vmatprep.subr.bf16.mxu0 %v796_v56  ;;  %1978 = vmatprep.subr.bf16.mxu1 %v796_v56 }
 0x17d   : > { %1833 = vmatpush3.bf16.msra.mxu0 %v788_v32  ;;  %1986 = vmatpush3.bf16.msra.mxu1 %v788_v32  ;;  %v2124_v32 = vld [vmem:[%s2421_s26 + $0xe0] ss:$8 sps:$4 sm:$0xff]  }
 0x17e   : > { %v1970_v57 = vpop.f32.mrb[24].mxu0  ;;  %1834 = vmatprep.subr.bf16.mxu0 %v797_v54  ;;  %1979 = vmatprep.subr.bf16.mxu1 %v797_v54 }
 0x17f   : > { %v691_v58 = vpop.f32.mrb[25].mxu0 }
 0x180   : > { %v1971_v59 = vpop.f32.mrb[26].mxu0 }
 0x181   : > { %v799_v60 = vpack.c.bf16 %v1971_v59, %v1970_v57  ;;  %v694_v61 = vpop.f32.mrb[27].mxu0  ;;  %1835 = vmatpush3.bf16.msra.mxu0 %v789_v30  ;;  %1987 = vmatpush3.bf16.msra.mxu1 %v789_v30  ;;  %v2118_v30 = vld [vmem:[%s2421_s26 + $0xd0] ss:$8 sps:$4 sm:$0xff]   ;;  %v734_v57 = vld [vmem:[#allocation2 + $0x60] sm:$0xff] }
 0x182   : > { %v798_v62 = vpack.c.bf16 %v694_v61, %v691_v58  ;;  %v724_v59 = vld [vmem:[#allocation2 + $0x10] sm:$0xff] }
 0x184   : > { %1836 = vmatprep.subr.bf16.mxu0 %v798_v62  ;;  %1980 = vmatprep.subr.bf16.mxu1 %v798_v62 }
 0x185   : > { %1837 = vmatpush3.bf16.msra.mxu0 %v790_v38  ;;  %1988 = vmatpush3.bf16.msra.mxu1 %v790_v38 }
 0x186   : > { %v1974_v63 = vpop.f32.mrb[28].mxu0  ;;  %1838 = vmatprep.subr.bf16.mxu0 %v799_v60  ;;  %1981 = vmatprep.subr.bf16.mxu1 %v799_v60 }
 0x187   : > { %v707_v0 = vpop.f32.mrb[29].mxu0 }
 0x188   : > { %v1975_v1 = vpop.f32.mrb[30].mxu0 }
 0x189   : > { %v801_v2 = vpack.c.bf16 %v1975_v1, %v1974_v63  ;;  %v710_v3 = vpop.f32.mrb[31].mxu0  ;;  %1839 = vmatpush3.bf16.msra.mxu0 %v791_v36  ;;  %1989 = vmatpush3.bf16.msra.mxu1 %v791_v36  ;;  %v735_v1 = vld [vmem:[#allocation2 + $0x68] sm:$0xff] }
 0x18a   : > { %v800_v4 = vpack.c.bf16 %v710_v3, %v707_v0  ;;  %v725_v3 = vld [vmem:[#allocation2 + $0x18] sm:$0xff] }
 0x18c   : > { %1840 = vmatprep.subr.bf16.mxu0 %v800_v4  ;;  %1982 = vmatprep.subr.bf16.mxu1 %v800_v4 }
 0x18d   : > { %1841 = vmatpush3.bf16.msra.mxu0 %v792_v44  ;;  %1990 = vmatpush3.bf16.msra.mxu1 %v792_v44 }
 0x18e   : > { %1842 = vmatprep.subr.bf16.mxu0 %v801_v2  ;;  %1983 = vmatprep.subr.bf16.mxu1 %v801_v2 }
 0x191   : > { %1843 = vmatpush3.bf16.msra.mxu0 %v793_v42  ;;  %1991 = vmatpush3.bf16.msra.mxu1 %v793_v42 }
 0x194   : > { %1035 = vmatmul.mubr.bf16.vlgmr.msra.gmra.mrb[0].mxu1 %v2083_v5  ;;  %995 = vmatmul.mubr.bf16.vlgmr.msra.gmra.mrb[32].mxu0 %v2101_v6 }
 0x195   : > { %1042 = vmatprep.mubr.bf16.mxu1 %v2086_v7  ;;  %1002 = vmatprep.mubr.bf16.mxu0 %v2107_v8 }
 0x19c   : > { %1043 = vmatmul.mubr.bf16.gmra.mrb[4].mxu1 %v2088_v9  ;;  %1003 = vmatmul.mubr.bf16.gmra.mrb[36].mxu0 %v2109_v10 }
 0x19d   : > { %1050 = vmatprep.mubr.bf16.mxu1 %v2089_v11  ;;  %1010 = vmatprep.mubr.bf16.mxu0 %v2113_v12 }
 0x1a4   : > { %1051 = vmatmul.mubr.bf16.gmra.mrb[8].mxu1 %v2091_v13  ;;  %1011 = vmatmul.mubr.bf16.gmra.mrb[40].mxu0 %v2115_v14  ;;  %v736_v13 = vld [vmem:[#allocation2 + $0x70] sm:$0xff] }
 0x1a5   : > { %1058 = vmatprep.mubr.bf16.mxu1 %v2092_v15  ;;  %1018 = vmatprep.mubr.bf16.mxu0 %v2119_v16  ;;  %v726_v15 = vld [vmem:[#allocation2 + $0x20] sm:$0xff] }
 0x1ac   : > { %1059 = vmatmul.mubr.bf16.gmra.mrb[12].mxu1 %v2094_v17  ;;  %1019 = vmatmul.mubr.bf16.gmra.mrb[44].mxu0 %v2121_v18 }
 0x1ad   : > { %1066 = vmatprep.mubr.bf16.mxu1 %v2095_v19  ;;  %1026 = vmatprep.mubr.bf16.mxu0 %v2125_v20 }
 0x1b4   : > { %1067 = vmatmul.mubr.bf16.gmra.mrb[16].mxu1 %v2097_v21  ;;  %1027 = vmatmul.mubr.bf16.gmra.mrb[48].mxu0 %v2127_v22  ;;  %v737_v21 = vld [vmem:[#allocation2 + $0x78] sm:$0xff] }
 0x1b5   : > { %1074 = vmatprep.mubr.bf16.mxu1 %v2098_v23  ;;  %v727_v23 = vld [vmem:[#allocation2 + $0x28] sm:$0xff] }
 0x1bc   : > { %1075 = vmatmul.mubr.bf16.gmra.mrb[20].mxu1 %v2100_v24 }
 0x1bd   : > { %1082 = vmatprep.mubr.bf16.mxu1 %v2104_v25 }
 0x1c4   : > { %1083 = vmatmul.mubr.bf16.gmra.mrb[24].mxu1 %v2106_v26 }
 0x1c5   : > { %1090 = vmatprep.mubr.bf16.mxu1 %v2110_v27 }
 0x1cc   : > { %1091 = vmatmul.mubr.bf16.gmra.mrb[28].mxu1 %v2112_v28 }
 0x1cd   : > { %1098 = vmatprep.mubr.bf16.mxu1 %v2116_v29 }
 0x1d4   : > { %1099 = vmatmul.mubr.bf16.gmra.mrb[32].mxu1 %v2118_v30 }
 0x1d5   : > { %1106 = vmatprep.mubr.bf16.mxu1 %v2122_v31 }
 0x1dc   : > { %1107 = vmatmul.mubr.bf16.gmra.mrb[36].mxu1 %v2124_v32 }
 0x1dd   : > { %1114 = vmatprep.mubr.bf16.mxu1 %v2128_v33  ;;  %v738_v33 = vld [vmem:[#allocation2 + $0x80] sm:$0xff] }
 0x1e4   : > { %1115 = vmatmul.mubr.bf16.gmra.mrb[40].mxu1 %v2130_v34 }
 0x267   : > { %v1874_v35 = vpop.f32.mrb[0].mxu1  ;;  %v1844_v36 = vpop.f32.mrb[32].mxu0 }
 0x268   : > { %v1875_v38 = vpop.f32.mrb[1].mxu1  ;;  %v1845_v40 = vpop.f32.mrb[33].mxu0 }
 0x269   : > { %v1876_v41 = vadd.f32 %v1875_v38, %v1874_v35  ;;  %v1877_v42 = vpop.f32.mrb[2].mxu1  ;;  %v1846_v43 = vadd.f32 %v1845_v40, %v1844_v36  ;;  %v1847_v44 = vpop.f32.mrb[34].mxu0  ;;  %v728_v35 = vld [vmem:[#allocation2 + $0x30] sm:$0xff] }
 0x26a   : > { %v1878_v46 = vpop.f32.mrb[3].mxu1  ;;  %v1848_v48 = vpop.f32.mrb[35].mxu0 }
 0x26b   : > { %v1133_v49 = vadd.f32 %v1876_v41, %v732_v37  ;;  %v1879_v50 = vadd.f32 %v1878_v46, %v1877_v42  ;;  %v1123_v51 = vadd.f32 %v1846_v43, %v722_v39  ;;  %v1849_v52 = vadd.f32 %v1848_v48, %v1847_v44  ;;  %v739_v41 = vld [vmem:[#allocation2 + $0x88] sm:$0xff]  ;;  %v729_v43 = vld [vmem:[#allocation2 + $0x38] sm:$0xff] }
 0x26d   : > { %1165 = vst [vmem:[#allocation2 + $0x50] sm:$0xff] %v1133_v49  ;;  %v1134_v53 = vadd.f32 %v1879_v50, %v733_v45  ;;  %1155 = vst [vmem:[#allocation2] sm:$0xff] %v1123_v51  ;;  %v1124_v54 = vadd.f32 %v1849_v52, %v723_v47 }
 0x26f   : > { %1166 = vst [vmem:[#allocation2 + $0x58] sm:$0xff] %v1134_v53  ;;  %v1880_v55 = vpop.f32.mrb[4].mxu1  ;;  %1156 = vst [vmem:[#allocation2 + $0x8] sm:$0xff] %v1124_v54  ;;  %v1850_v56 = vpop.f32.mrb[36].mxu0  ;;  %v740_v53 = vld [vmem:[#allocation2 + $0x90] sm:$0xff] }
 0x270   : > { %v1881_v58 = vpop.f32.mrb[5].mxu1  ;;  %v1851_v60 = vpop.f32.mrb[37].mxu0 }
 0x271   : > { %v1882_v61 = vadd.f32 %v1881_v58, %v1880_v55  ;;  %v1883_v62 = vpop.f32.mrb[6].mxu1  ;;  %v1852_v63 = vadd.f32 %v1851_v60, %v1850_v56  ;;  %v1853_v0 = vpop.f32.mrb[38].mxu0  ;;  %v730_v55 = vld [vmem:[#allocation2 + $0x40] sm:$0xff] }
 0x272   : > { %v1884_v2 = vpop.f32.mrb[7].mxu1  ;;  %v1854_v4 = vpop.f32.mrb[39].mxu0 }
 0x273   : > { %v1135_v5 = vadd.f32 %v1882_v61, %v734_v57  ;;  %v1885_v6 = vadd.f32 %v1884_v2, %v1883_v62  ;;  %v1125_v7 = vadd.f32 %v1852_v63, %v724_v59  ;;  %v1855_v8 = vadd.f32 %v1854_v4, %v1853_v0  ;;  %v741_v61 = vld [vmem:[#allocation2 + $0x98] sm:$0xff]  ;;  %v731_v63 = vld [vmem:[#allocation2 + $0x48] sm:$0xff] }
 0x275   : > { %1167 = vst [vmem:[#allocation2 + $0x60] sm:$0xff] %v1135_v5  ;;  %v1136_v9 = vadd.f32 %v1885_v6, %v735_v1  ;;  %1157 = vst [vmem:[#allocation2 + $0x10] sm:$0xff] %v1125_v7  ;;  %v1126_v10 = vadd.f32 %v1855_v8, %v725_v3  ;;  %v742_v8 = vld [vmem:[#allocation2 + $0xa0] sm:$0xff] }
 0x277   : > { %1168 = vst [vmem:[#allocation2 + $0x68] sm:$0xff] %v1136_v9  ;;  %v1886_v11 = vpop.f32.mrb[8].mxu1  ;;  %1158 = vst [vmem:[#allocation2 + $0x18] sm:$0xff] %v1126_v10  ;;  %v1856_v12 = vpop.f32.mrb[40].mxu0 }
 0x278   : > { %v1887_v14 = vpop.f32.mrb[9].mxu1  ;;  %v1857_v16 = vpop.f32.mrb[41].mxu0 }
 0x279   : > { %v1888_v17 = vadd.f32 %v1887_v14, %v1886_v11  ;;  %v1889_v18 = vpop.f32.mrb[10].mxu1  ;;  %v1858_v19 = vadd.f32 %v1857_v16, %v1856_v12  ;;  %v1859_v20 = vpop.f32.mrb[42].mxu0  ;;  %v743_v12 = vld [vmem:[#allocation2 + $0xa8] sm:$0xff] }
 0x27a   : > { %v1890_v22 = vpop.f32.mrb[11].mxu1  ;;  %v1860_v24 = vpop.f32.mrb[43].mxu0 }
 0x27b   : > { %v1137_v25 = vadd.f32 %v1888_v17, %v736_v13  ;;  %v1891_v26 = vadd.f32 %v1890_v22, %v1889_v18  ;;  %v1127_v27 = vadd.f32 %v1858_v19, %v726_v15  ;;  %v1861_v28 = vadd.f32 %v1860_v24, %v1859_v20  ;;  %v744_v18 = vld [vmem:[#allocation2 + $0xb0] sm:$0xff]  ;;  %v745_v22 = vld [vmem:[#allocation2 + $0xb8] sm:$0xff] }
 0x27d   : > { %1169 = vst [vmem:[#allocation2 + $0x70] sm:$0xff] %v1137_v25  ;;  %v1138_v29 = vadd.f32 %v1891_v26, %v737_v21  ;;  %1159 = vst [vmem:[#allocation2 + $0x20] sm:$0xff] %v1127_v27  ;;  %v1128_v30 = vadd.f32 %v1861_v28, %v727_v23  ;;  %v746_v28 = vld [vmem:[#allocation2 + $0xc0] sm:$0xff] }
 0x27f   : > { %1170 = vst [vmem:[#allocation2 + $0x78] sm:$0xff] %v1138_v29  ;;  %v1892_v31 = vpop.f32.mrb[12].mxu1  ;;  %1160 = vst [vmem:[#allocation2 + $0x28] sm:$0xff] %v1128_v30  ;;  %v1862_v32 = vpop.f32.mrb[44].mxu0 }
 0x280   : > { %v1893_v34 = vpop.f32.mrb[13].mxu1  ;;  %v1863_v36 = vpop.f32.mrb[45].mxu0 }
 0x281   : > { %v1894_v37 = vadd.f32 %v1893_v34, %v1892_v31  ;;  %v1895_v38 = vpop.f32.mrb[14].mxu1  ;;  %v1864_v39 = vadd.f32 %v1863_v36, %v1862_v32  ;;  %v1865_v40 = vpop.f32.mrb[46].mxu0  ;;  %v747_v32 = vld [vmem:[#allocation2 + $0xc8] sm:$0xff] }
 0x282   : > { %v1896_v42 = vpop.f32.mrb[15].mxu1  ;;  %v1866_v44 = vpop.f32.mrb[47].mxu0 }
 0x283   : > { %v1139_v45 = vadd.f32 %v1894_v37, %v738_v33  ;;  %v1897_v46 = vadd.f32 %v1896_v42, %v1895_v38  ;;  %v1129_v47 = vadd.f32 %v1864_v39, %v728_v35  ;;  %v1867_v48 = vadd.f32 %v1866_v44, %v1865_v40  ;;  %v748_v38 = vld [vmem:[#allocation2 + $0xd0] sm:$0xff]  ;;  %v749_v42 = vld [vmem:[#allocation2 + $0xd8] sm:$0xff] }
 0x285   : > { %1171 = vst [vmem:[#allocation2 + $0x80] sm:$0xff] %v1139_v45  ;;  %v1140_v49 = vadd.f32 %v1897_v46, %v739_v41  ;;  %1161 = vst [vmem:[#allocation2 + $0x30] sm:$0xff] %v1129_v47  ;;  %v1130_v50 = vadd.f32 %v1867_v48, %v729_v43  ;;  %v750_v48 = vld [vmem:[#allocation2 + $0xe0] sm:$0xff] }
 0x287   : > { %1172 = vst [vmem:[#allocation2 + $0x88] sm:$0xff] %v1140_v49  ;;  %v1898_v51 = vpop.f32.mrb[16].mxu1  ;;  %1162 = vst [vmem:[#allocation2 + $0x38] sm:$0xff] %v1130_v50  ;;  %v1868_v52 = vpop.f32.mrb[48].mxu0 }
 0x288   : > { %v1899_v54 = vpop.f32.mrb[17].mxu1  ;;  %v1869_v56 = vpop.f32.mrb[49].mxu0 }
 0x289   : > { %v1900_v57 = vadd.f32 %v1899_v54, %v1898_v51  ;;  %v1901_v58 = vpop.f32.mrb[18].mxu1  ;;  %v1870_v59 = vadd.f32 %v1869_v56, %v1868_v52  ;;  %v1871_v60 = vpop.f32.mrb[50].mxu0  ;;  %v751_v52 = vld [vmem:[#allocation2 + $0xe8] sm:$0xff] }
 0x28a   : > { %v1902_v62 = vpop.f32.mrb[19].mxu1  ;;  %v1872_v0 = vpop.f32.mrb[51].mxu0 }
 0x28b   : > { %v1141_v1 = vadd.f32 %v1900_v57, %v740_v53  ;;  %v1903_v2 = vadd.f32 %v1902_v62, %v1901_v58  ;;  %v1131_v3 = vadd.f32 %v1870_v59, %v730_v55  ;;  %v1873_v4 = vadd.f32 %v1872_v0, %v1871_v60  ;;  %v752_v58 = vld [vmem:[#allocation2 + $0xf0] sm:$0xff]  ;;  %v753_v62 = vld [vmem:[#allocation2 + $0xf8] sm:$0xff] }
 0x28d   : > { %1173 = vst [vmem:[#allocation2 + $0x90] sm:$0xff] %v1141_v1  ;;  %v1142_v5 = vadd.f32 %v1903_v2, %v741_v61  ;;  %1163 = vst [vmem:[#allocation2 + $0x40] sm:$0xff] %v1131_v3  ;;  %v1132_v6 = vadd.f32 %v1873_v4, %v731_v63 }
 0x28f   : > { %1174 = vst [vmem:[#allocation2 + $0x98] sm:$0xff] %v1142_v5  ;;  %v1904_v7 = vpop.f32.mrb[20].mxu1  ;;  %1164 = vst [vmem:[#allocation2 + $0x48] sm:$0xff] %v1132_v6 }
 0x290   : > { %v1905_v9 = vpop.f32.mrb[21].mxu1 }
 0x291   : > { %v1906_v10 = vadd.f32 %v1905_v9, %v1904_v7  ;;  %v1907_v11 = vpop.f32.mrb[22].mxu1 }
 0x292   : > { %v1908_v13 = vpop.f32.mrb[23].mxu1 }
 0x293   : > { %v1143_v14 = vadd.f32 %v1906_v10, %v742_v8  ;;  %v1909_v15 = vadd.f32 %v1908_v13, %v1907_v11 }
 0x295   : > { %1175 = vst [vmem:[#allocation2 + $0xa0] sm:$0xff] %v1143_v14  ;;  %v1144_v16 = vadd.f32 %v1909_v15, %v743_v12 }
 0x297   : > { %1176 = vst [vmem:[#allocation2 + $0xa8] sm:$0xff] %v1144_v16  ;;  %v1910_v17 = vpop.f32.mrb[24].mxu1 }
 0x298   : > { %v1911_v19 = vpop.f32.mrb[25].mxu1 }
 0x299   : > { %v1912_v20 = vadd.f32 %v1911_v19, %v1910_v17  ;;  %v1913_v21 = vpop.f32.mrb[26].mxu1 }
 0x29a   : > { %v1914_v23 = vpop.f32.mrb[27].mxu1 }
 0x29b   : > { %v1145_v24 = vadd.f32 %v1912_v20, %v744_v18  ;;  %v1915_v25 = vadd.f32 %v1914_v23, %v1913_v21 }
 0x29d   : > { %1177 = vst [vmem:[#allocation2 + $0xb0] sm:$0xff] %v1145_v24  ;;  %v1146_v26 = vadd.f32 %v1915_v25, %v745_v22 }
 0x29f   : > { %1178 = vst [vmem:[#allocation2 + $0xb8] sm:$0xff] %v1146_v26  ;;  %v1916_v27 = vpop.f32.mrb[28].mxu1 }
 0x2a0   : > { %v1917_v29 = vpop.f32.mrb[29].mxu1 }
 0x2a1   : > { %v1918_v30 = vadd.f32 %v1917_v29, %v1916_v27  ;;  %v1919_v31 = vpop.f32.mrb[30].mxu1 }
 0x2a2   : > { %v1920_v33 = vpop.f32.mrb[31].mxu1 }
 0x2a3   : > { %v1147_v34 = vadd.f32 %v1918_v30, %v746_v28  ;;  %v1921_v35 = vadd.f32 %v1920_v33, %v1919_v31 }
 0x2a5   : > { %1179 = vst [vmem:[#allocation2 + $0xc0] sm:$0xff] %v1147_v34  ;;  %v1148_v36 = vadd.f32 %v1921_v35, %v747_v32 }
 0x2a7   : > { %1180 = vst [vmem:[#allocation2 + $0xc8] sm:$0xff] %v1148_v36  ;;  %v1922_v37 = vpop.f32.mrb[32].mxu1 }
 0x2a8   : > { %v1923_v39 = vpop.f32.mrb[33].mxu1 }
 0x2a9   : > { %v1924_v40 = vadd.f32 %v1923_v39, %v1922_v37  ;;  %v1925_v41 = vpop.f32.mrb[34].mxu1 }
 0x2aa   : > { %v1926_v43 = vpop.f32.mrb[35].mxu1 }
 0x2ab   : > { %v1149_v44 = vadd.f32 %v1924_v40, %v748_v38  ;;  %v1927_v45 = vadd.f32 %v1926_v43, %v1925_v41 }
 0x2ad   : > { %1181 = vst [vmem:[#allocation2 + $0xd0] sm:$0xff] %v1149_v44  ;;  %v1150_v46 = vadd.f32 %v1927_v45, %v749_v42 }
 0x2af   : > { %1182 = vst [vmem:[#allocation2 + $0xd8] sm:$0xff] %v1150_v46  ;;  %v1928_v47 = vpop.f32.mrb[36].mxu1 }
 0x2b0   : > { %v1929_v49 = vpop.f32.mrb[37].mxu1 }
 0x2b1   : > { %v1930_v50 = vadd.f32 %v1929_v49, %v1928_v47  ;;  %v1931_v51 = vpop.f32.mrb[38].mxu1 }
 0x2b2   : > { %v1932_v53 = vpop.f32.mrb[39].mxu1 }
 0x2b3   : > { %v1151_v54 = vadd.f32 %v1930_v50, %v750_v48  ;;  %v1933_v55 = vadd.f32 %v1932_v53, %v1931_v51 }
 0x2b5   : > { %1183 = vst [vmem:[#allocation2 + $0xe0] sm:$0xff] %v1151_v54  ;;  %v1152_v56 = vadd.f32 %v1933_v55, %v751_v52 }
 0x2b7   : > { %1184 = vst [vmem:[#allocation2 + $0xe8] sm:$0xff] %v1152_v56  ;;  %v1934_v57 = vpop.f32.mrb[40].mxu1 }
 0x2b8   : > { %v1935_v59 = vpop.f32.mrb[41].mxu1 }
 0x2b9   : > { %v1936_v60 = vadd.f32 %v1935_v59, %v1934_v57  ;;  %v1937_v61 = vpop.f32.mrb[42].mxu1 }
 0x2ba   : > { %v1938_v63 = vpop.f32.mrb[43].mxu1 }
 0x2bb   : > { %v1153_v0 = vadd.f32 %v1936_v60, %v752_v58  ;;  %v1939_v1 = vadd.f32 %v1938_v63, %v1937_v61 }
 0x2bd   : > { %1185 = vst [vmem:[#allocation2 + $0xf0] sm:$0xff] %v1153_v0  ;;  %v1154_v2 = vadd.f32 %v1939_v1, %v753_v62 }
 0x2bf   : > { %1186 = vst [vmem:[#allocation2 + $0xf8] sm:$0xff] %v1154_v2 }
 0x2c0 PF: > { %p1187_p3 = scmp.eq.s32.totalorder %s2259_s8, 3 }
 0x2c1   : > { %v1192_v3 = vld [vmem:[#allocation2] sm:$0xff] (%p1187_p3)  ;;  %v1193_v4 = vld [vmem:[#allocation2 + $0x8] sm:$0xff] (%p1187_p3)  ;;  %v1194_v8 = vld [vmem:[#allocation2 + $0x10] sm:$0xff] (%p1187_p3) }
 0x2c2   : > { %1191 = sbr.rel (!%p1187_p3) target bundleno = 731 (0x2db), region = 52  ;;  %v2512_v5 = vld [vmem:[%s2596_s5] ss:$0 sm:$0xff] (%p1187_p3)  ;;  %v1195_v9 = vld [vmem:[#allocation2 + $0x18] sm:$0xff] (%p1187_p3)  ;;  %v1197_v13 = vld [vmem:[#allocation2 + $0x28] sm:$0xff] (%p1187_p3) }
 0x2c3   : > { %v1231_v6 = vadd.f32 (%p1187_p3), %v2512_v5, %v1192_v3  ;;  %v1232_v7 = vadd.f32 (%p1187_p3), %v2512_v5, %v1193_v4  ;;  %v1196_v10 = vld [vmem:[#allocation2 + $0x20] sm:$0xff] (%p1187_p3)  ;;  %v1233_v11 = vadd.f32 (%p1187_p3), %v2512_v5, %v1194_v8  ;;  %v1234_v12 = vadd.f32 (%p1187_p3), %v2512_v5, %v1195_v9  ;;  %v1198_v15 = vld [vmem:[#allocation2 + $0x30] sm:$0xff] (%p1187_p3)  ;;  %v1199_v16 = vld [vmem:[#allocation2 + $0x38] sm:$0xff] (%p1187_p3) }
 0x2c4   : > { %v1235_v14 = vadd.f32 (%p1187_p3), %v2512_v5, %v1196_v10  ;;  %v1236_v19 = vadd.f32 (%p1187_p3), %v2512_v5, %v1197_v13  ;;  %v1237_v20 = vadd.f32 (%p1187_p3), %v2512_v5, %v1198_v15  ;;  %v1200_v21 = vld [vmem:[#allocation2 + $0x40] sm:$0xff] (%p1187_p3)  ;;  %v1201_v22 = vld [vmem:[#allocation2 + $0x48] sm:$0xff] (%p1187_p3)  ;;  %v1202_v23 = vld [vmem:[#allocation2 + $0x50] sm:$0xff] (%p1187_p3)  ;;  %v1238_v27 = vadd.f32 (%p1187_p3), %v2512_v5, %v1199_v16 }
 0x2c5   : > { %v1263_v17 = vmax.f32 (%p1187_p3), %v1231_v6, 0.0  ;;  %v1264_v18 = vmax.f32 (%p1187_p3), %v1232_v7, 0.0  ;;  %v1265_v24 = vmax.f32 (%p1187_p3), %v1233_v11, 0.0  ;;  %v1266_v25 = vmax.f32 (%p1187_p3), %v1234_v12, 0.0  ;;  %v1203_v28 = vld [vmem:[#allocation2 + $0x58] sm:$0xff] (%p1187_p3)  ;;  %v1204_v29 = vld [vmem:[#allocation2 + $0x60] sm:$0xff] (%p1187_p3) }
 0x2c6   : > { %v1267_v26 = vmax.f32 (%p1187_p3), %v1235_v14, 0.0  ;;  %v1268_v31 = vmax.f32 (%p1187_p3), %v1236_v19, 0.0  ;;  %v1269_v32 = vmax.f32 (%p1187_p3), %v1237_v20, 0.0  ;;  %v1239_v33 = vadd.f32 (%p1187_p3), %v2512_v5, %v1200_v21  ;;  %v1205_v34 = vld [vmem:[#allocation2 + $0x68] sm:$0xff] (%p1187_p3)  ;;  %v1206_v39 = vld [vmem:[#allocation2 + $0x70] sm:$0xff] (%p1187_p3)  ;;  %v1207_v40 = vld [vmem:[#allocation2 + $0x78] sm:$0xff] (%p1187_p3) }
 0x2c7   : > { %v1718_v30 = vpack.c.bf16 (%p1187_p3), %v1264_v18, %v1263_v17  ;;  %v1723_v35 = vpack.c.bf16 (%p1187_p3), %v1266_v25, %v1265_v24  ;;  %v1270_v36 = vmax.f32 (%p1187_p3), %v1238_v27, 0.0  ;;  %v1240_v37 = vadd.f32 (%p1187_p3), %v2512_v5, %v1201_v22  ;;  %v1208_v45 = vld [vmem:[#allocation2 + $0x80] sm:$0xff] (%p1187_p3)  ;;  %v1209_v46 = vld [vmem:[#allocation2 + $0x88] sm:$0xff] (%p1187_p3)  ;;  %v1210_v51 = vld [vmem:[#allocation2 + $0x90] sm:$0xff] (%p1187_p3) }
 0x2c8   : > { %v1241_v38 = vadd.f32 (%p1187_p3), %v2512_v5, %v1202_v23  ;;  %v1728_v41 = vpack.c.bf16 (%p1187_p3), %v1268_v31, %v1267_v26  ;;  %v1271_v42 = vmax.f32 (%p1187_p3), %v1239_v33, 0.0  ;;  %v1242_v43 = vadd.f32 (%p1187_p3), %v2512_v5, %v1203_v28  ;;  %v1211_v56 = vld [vmem:[#allocation2 + $0x98] sm:$0xff] (%p1187_p3)  ;;  %v1212_v61 = vld [vmem:[#allocation2 + $0xa0] sm:$0xff] (%p1187_p3)  ;;  %v1213_v62 = vld [vmem:[#allocation2 + $0xa8] sm:$0xff] (%p1187_p3) }
 0x2c9   : > { %1719 = vst [vmem:[#allocation9] sm:$0xff] %v1718_v30   ;;  %v1243_v44 = vadd.f32 %v2512_v5, %v1204_v29  ;;  %1795 = vst [vmem:[#allocation9 + $0x8] sm:$0xff] %v1723_v35   ;;  %v1733_v47 = vpack.c.bf16 %v1270_v36, %v1269_v32  ;;  %v1272_v48 = vmax.f32 %v1240_v37, 0.0  ;;  %v1244_v50 = vadd.f32 %v2512_v5, %v1205_v34  ;;  %v1214_v3 = vld [vmem:[#allocation2 + $0xb0] sm:$0xff]  ;;  %v1215_v4 = vld [vmem:[#allocation2 + $0xb8] sm:$0xff] }
 0x2ca   : > { %v1273_v49 = vmax.f32 %v1241_v38, 0.0  ;;  %1796 = vst [vmem:[#allocation9 + $0x10] sm:$0xff] %v1728_v41   ;;  %v1274_v52 = vmax.f32 %v1242_v43, 0.0  ;;  %v1245_v54 = vadd.f32 %v2512_v5, %v1206_v39  ;;  %v1246_v55 = vadd.f32 %v2512_v5, %v1207_v40  ;;  %v1216_v10 = vld [vmem:[#allocation2 + $0xc0] sm:$0xff]  ;;  %v1217_v11 = vld [vmem:[#allocation2 + $0xc8] sm:$0xff]  ;;  %v1218_v16 = vld [vmem:[#allocation2 + $0xd0] sm:$0xff] }
 0x2cb   : > { %v1275_v53 = vmax.f32 %v1243_v44, 0.0  ;;  %1797 = vst [vmem:[#allocation9 + $0x18] sm:$0xff] %v1733_v47   ;;  %v1738_v57 = vpack.c.bf16 %v1272_v48, %v1271_v42  ;;  %v1276_v58 = vmax.f32 %v1244_v50, 0.0  ;;  %v1247_v59 = vadd.f32 %v2512_v5, %v1208_v45  ;;  %v1219_v21 = vld [vmem:[#allocation2 + $0xd8] sm:$0xff]  ;;  %v1220_v26 = vld [vmem:[#allocation2 + $0xe0] sm:$0xff]  ;;  %v1221_v27 = vld [vmem:[#allocation2 + $0xe8] sm:$0xff] }
 0x2cc   : > { %v1248_v60 = vadd.f32 %v2512_v5, %v1209_v46  ;;  %v1743_v63 = vpack.c.bf16 %v1274_v52, %v1273_v49  ;;  %v1277_v0 = vmax.f32 %v1245_v54, 0.0  ;;  %v1278_v1 = vmax.f32 %v1246_v55, 0.0  ;;  %v1222_v32 = vld [vmem:[#allocation2 + $0xf0] sm:$0xff]  ;;  %v1223_v33 = vld [vmem:[#allocation2 + $0xf8] sm:$0xff] }
 0x2cd   : > { %v1249_v2 = vadd.f32 %v2512_v5, %v1210_v51  ;;  %1798 = vst [vmem:[#allocation9 + $0x20] sm:$0xff] %v1738_v57   ;;  %v1748_v6 = vpack.c.bf16 %v1276_v58, %v1275_v53  ;;  %v1279_v7 = vmax.f32 %v1247_v59, 0.0  ;;  %v1250_v9 = vadd.f32 %v2512_v5, %v1211_v56 }
 0x2ce   : > { %v1280_v8 = vmax.f32 %v1248_v60, 0.0  ;;  %1799 = vst [vmem:[#allocation9 + $0x28] sm:$0xff] %v1743_v63   ;;  %v1753_v12 = vpack.c.bf16 %v1278_v1, %v1277_v0  ;;  %v1251_v14 = vadd.f32 %v2512_v5, %v1212_v61  ;;  %v1252_v15 = vadd.f32 %v2512_v5, %v1213_v62 }
 0x2cf   : > { %v1281_v13 = vmax.f32 %v1249_v2, 0.0  ;;  %1800 = vst [vmem:[#allocation9 + $0x30] sm:$0xff] %v1748_v6   ;;  %v1282_v18 = vmax.f32 %v1250_v9, 0.0  ;;  %v1253_v19 = vadd.f32 %v2512_v5, %v1214_v3  ;;  %v1254_v20 = vadd.f32 %v2512_v5, %v1215_v4 }
 0x2d0   : > { %v1758_v17 = vpack.c.bf16 %v1280_v8, %v1279_v7  ;;  %1801 = vst [vmem:[#allocation9 + $0x38] sm:$0xff] %v1753_v12   ;;  %v1283_v22 = vmax.f32 %v1251_v14, 0.0  ;;  %v1284_v23 = vmax.f32 %v1252_v15, 0.0  ;;  %v1255_v24 = vadd.f32 %v2512_v5, %v1216_v10 }
 0x2d1   : > { %v1256_v25 = vadd.f32 %v2512_v5, %v1217_v11  ;;  %v1763_v28 = vpack.c.bf16 %v1282_v18, %v1281_v13  ;;  %v1285_v29 = vmax.f32 %v1253_v19, 0.0  ;;  %v1286_v30 = vmax.f32 %v1254_v20, 0.0 }
 0x2d2   : > { %1802 = vst [vmem:[#allocation9 + $0x40] sm:$0xff] %v1758_v17   ;;  %v1257_v31 = vadd.f32 %v2512_v5, %v1218_v16  ;;  %v1768_v34 = vpack.c.bf16 %v1284_v23, %v1283_v22  ;;  %v1287_v35 = vmax.f32 %v1255_v24, 0.0  ;;  %v1258_v37 = vadd.f32 %v2512_v5, %v1219_v21 }
 0x2d3   : > { %v1288_v36 = vmax.f32 %v1256_v25, 0.0  ;;  %1803 = vst [vmem:[#allocation9 + $0x48] sm:$0xff] %v1763_v28   ;;  %v1773_v38 = vpack.c.bf16 %v1286_v30, %v1285_v29  ;;  %v1259_v40 = vadd.f32 %v2512_v5, %v1220_v26  ;;  %v1260_v41 = vadd.f32 %v2512_v5, %v1221_v27 }
 0x2d4   : > { %v1289_v39 = vmax.f32 %v1257_v31, 0.0  ;;  %1804 = vst [vmem:[#allocation9 + $0x50] sm:$0xff] %v1768_v34   ;;  %v1290_v43 = vmax.f32 %v1258_v37, 0.0  ;;  %v1261_v44 = vadd.f32 %v2512_v5, %v1222_v32  ;;  %v1262_v45 = vadd.f32 %v2512_v5, %v1223_v33 }
 0x2d5   : > { %v1778_v42 = vpack.c.bf16 %v1288_v36, %v1287_v35  ;;  %1805 = vst [vmem:[#allocation9 + $0x58] sm:$0xff] %v1773_v38   ;;  %v1291_v46 = vmax.f32 %v1259_v40, 0.0  ;;  %v1292_v47 = vmax.f32 %v1260_v41, 0.0 }
 0x2d6   : > { %v1783_v48 = vpack.c.bf16 %v1290_v43, %v1289_v39  ;;  %v1293_v49 = vmax.f32 %v1261_v44, 0.0  ;;  %v1294_v50 = vmax.f32 %v1262_v45, 0.0 }
 0x2d7   : > { %1806 = vst [vmem:[#allocation9 + $0x60] sm:$0xff] %v1778_v42   ;;  %v1788_v51 = vpack.c.bf16 %v1292_v47, %v1291_v46 }
 0x2d8   : > { %1807 = vst [vmem:[#allocation9 + $0x68] sm:$0xff] %v1783_v48   ;;  %v1793_v52 = vpack.c.bf16 %v1294_v50, %v1293_v49 }
 0x2d9   : > { %1808 = vst [vmem:[#allocation9 + $0x70] sm:$0xff] %v1788_v51  }
 0x2da   : > { %1809 = vst [vmem:[#allocation9 + $0x78] sm:$0xff] %v1793_v52  }
 0x2db PF: > { %p2548_p4 = scmp.eq.s32.totalorder %s1560_s12, 3  ;;  %s2275_s21 = smov [#allocation9]  }
 0x2dc   : > { %s1464_s23 = sshll.u32 %s2275_s21, 4  ;;  %s1465_s23 = int_to_ptr.vmem [resolvable:$true] %s1464_s23 }
 0x2dd   : > { %s2185_s25 = scalar_lea.vmem %s1465_s23, 2048  ;;  %p2192_p11 = scmp.lt.s32.totalorder %s1465_s23, %s1465_s23 }
 0x2de   : > { %p2186_p6 = scmp.ne.s32.totalorder %s1465_s23, %s2185_s25  ;;  %p2193_p13 = scmp.lt.s32.totalorder %s2185_s25, %s2185_s25 }
 0x2e0   : > { %p2187_p7 = pnand %p2186_p6, %p2548_p4  ;;  %p2194_p0 = por %p2193_p13, %p2192_p11 }
 0x2e2   : > { %p2188_p9 = pneg %p2187_p7 }
 0x2e4   : > { %p2195_p2 = pnand %p2194_p0, %p2188_p9 }
 0x2e6   : > { %2198 = shalt.err (!%p2195_p2)
}
 0x2e7   : > { %s2199_s12 = scalar_lea.hbm %s2597_s6, 2048 }
 0x2e8   : > { %p2200_p1 = scmp.ne.s32.totalorder %s2597_s6, %s2199_s12  ;;  %p2205_p8 = scmp.lt.u32.totalorder %s2199_s12, %s2597_s6 }
 0x2ea   : > { %p2201_p5 = pnand %p2200_p1, %p2548_p4 }
 0x2ec   : > { %p2202_p10 = pneg %p2201_p5 }
 0x2ee   : > { %p2207_p12 = pnand %p2205_p8, %p2202_p10 }
 0x2f0   : > { %2210 = shalt.err (!%p2207_p12)
}
 0x2f1   : > { %s2276_s27 = smov 64   ;;  %s2277_s0 = smov 4  }
 0x2f2   : > { %1997 = dma.vmem_to_hbm [thread:$0]  (%p2548_p4), %s1465_s23, 2048, %s2597_s6, [#allocation8], %s2276_s27, %s2276_s27, %s2277_s0  }
 0x2f3   : > { %2242 = dma.done.wait (%p2548_p4), [#allocation8], 2048  }
 0x2f4   : > { %2244 = vsyncadd (%p2548_p4), [#allocation8], 4294965248 }
 0x2f5 PF: > { %s30_s10 = sadd.s32 1, %s2267_s10   ;;  %s2605_s1 = smov %s2251_s30 }
 0x2f6   : > { %p27_p3 = scmp.ge.s32.totalorder %s30_s10, 6   ;;  %s2606_s30 = smov %s2255_s7 }
 0x2f7   : > { %s2607_s7 = smov %s2373_s24  ;;  %s2608_s8 = smov %s2263_s9 }
 0x2f8   : > { %s2609_s9 = smov %s2611_s11  ;;  %29 = sbr.rel (!%p27_p3) target bundleno = 30 (0x1e), region = 92 }
 0x2ff   :  { %1480 = vsyncpa [#allocation7], 1 }
 0x300   :  { %1482 = vsyncpa [#allocation7 + $0x1], 1 }
 0x301   :  { %1483 = vsyncpa [#allocation8], 1 }
 0x302   :  { %1485 = vsyncpa [#allocation8 + $0x1], 1 }

</bundles_post_ra>
